<compile_context>
chip_gen: v5e
topology: v5e:2x2
jax: 0.10.0
libtpu: 0.0.40
codegen_flags: <defaults>
</compile_context>

<pallas_src>
import math
from functools import partial

import jax
import jax.numpy as jnp
from jax.experimental import pallas as pl
from jax.experimental.pallas import tpu as pltpu

EPS = 1e-5  # nn.LayerNorm default


def _round_up(n, m):
    return -(-n // m) * m


def _layernorm(h, gamma, beta):
    # Two-pass form (same as nn.LayerNorm / the reference): robust to the
    # catastrophic-cancellation issue of E[x^2] - E[x]^2.
    mu = jnp.mean(h, axis=-1, keepdims=True)
    c = h - mu
    var = jnp.mean(c * c, axis=-1, keepdims=True)
    return c * jax.lax.rsqrt(var + EPS) * gamma + beta


def _gelu_exact(h):
    # PyTorch nn.GELU() default = exact erf formulation.
    return 0.5 * h * (1.0 + jax.lax.erf(h * (1.0 / math.sqrt(2.0))))


def _gelu_tanh(h):
    # Perf path: tanh goes to the EUP slot instead of a long VALU polynomial.
    return jax.nn.gelu(h, approximate=True)


# ---------------------------------------------------------------------------
# Kernel
# ---------------------------------------------------------------------------
def pattern_kernel(x_ref, w1_ref, w2_ref, w3_ref, w4_ref, p_ref, o_ref, *,
                   nsub, approx_gelu):
    gelu = _gelu_tanh if approx_gelu else _gelu_exact

    # One packed (16, H) parameter slab:
    # rows 0..9 = b1, g1, be1, b2, g2, be2, b3, g3, be3, b4 (rest padding).
    p = p_ref[...]
    b1, g1, be1 = p[0:1, :], p[1:2, :], p[2:3, :]
    b2, g2, be2 = p[3:4, :], p[4:5, :], p[5:6, :]
    b3, g3, be3 = p[6:7, :], p[7:8, :], p[8:9, :]
    b4 = p[9:10, :]

    # Weights hoisted once per tile; f32 or bf16 inputs, f32 accumulation.
    w1, w2, w3, w4 = w1_ref[...], w2_ref[...], w3_ref[...], w4_ref[...]
    mm_dtype = w1.dtype

    def mm(h, w, b):
        return jnp.dot(h.astype(mm_dtype), w,
                       preferred_element_type=jnp.float32) + b

    csize = x_ref.shape[0] // nsub
    # `nsub` independent row sub-chunks, statically unrolled: the scheduler
    # can overlap sub-chunk j's LN/GELU/sigmoid (VPU/EUP/XLU) with sub-chunk
    # j+1's matmuls (MXU) instead of letting the units take turns idling.
    for j in range(nsub):
        rs = slice(j * csize, (j + 1) * csize)
        x = x_ref[rs, :].astype(jnp.float32)

        # processor: Linear -> LayerNorm -> GELU -> Linear -> LayerNorm
        h = gelu(_layernorm(mm(x, w1, b1), g1, be1))
        feat = _layernorm(mm(h, w2, b2), g2, be2)

        # pattern_gate(features): Linear -> LN -> GELU -> Linear -> Sigmoid
        g = gelu(_layernorm(mm(feat, w3, b3), g3, be3))
        gate = jax.nn.sigmoid(mm(g, w4, b4))

        o_ref[rs, :] = (feat * gate + x).astype(o_ref.dtype)


# ---------------------------------------------------------------------------
# Capability / hardware helpers
# ---------------------------------------------------------------------------
_BUFFERED1_OK = None


def _buffered1_supported():
    """One-time probe for pl.Buffered(1) (single-buffered grid-invariant
    operands), run on a tiny throwaway kernel so a failure here can never mask
    an error in the real kernel."""
    global _BUFFERED1_OK
    if _BUFFERED1_OK is None:
        def k(a_ref, o_ref):
            o_ref[...] = a_ref[...] + 1.0
        try:
            f = pl.pallas_call(
                k,
                out_shape=jax.ShapeDtypeStruct((8, 128), jnp.float32),
                grid_spec=pltpu.PrefetchScalarGridSpec(
                    num_scalar_prefetch=0,
                    grid=(1,),
                    in_specs=[pl.BlockSpec((8, 128), lambda i: (0, 0),
                                           pipeline_mode=pl.Buffered(1))],
                    out_specs=pl.BlockSpec((8, 128), lambda i: (0, 0)),
                ),
            )
            jax.block_until_ready(f(jnp.zeros((8, 128), jnp.float32)))
            _BUFFERED1_OK = True
        except Exception:  # probe only — isolated from the real kernel
            _BUFFERED1_OK = False
    return _BUFFERED1_OK


def _vmem_capacity_bytes():
    """Per-core VMEM capacity; falls back to the smallest generation (v7x,
    64 MiB) if the query is unavailable."""
    try:
        info = pltpu.get_tpu_info()
        cap = getattr(info, "vmem_capacity_bytes", None)
        if cap:
            return int(cap)
    except (AttributeError, RuntimeError, ValueError, NotImplementedError):
        pass
    return 64 << 20


def _fixed_bytes(H, mm_itemsize, wbuf):
    # Four (H,H) weight tiles + one (16,H) f32 parameter slab.
    return (4 * H * H * mm_itemsize + 16 * H * 4) * wbuf


def _tile_bytes(tm, H, x_itemsize):
    # x + out, double-buffered, plus ~8 live f32 intermediates per tile.
    return 2 * 2 * tm * H * x_itemsize + 8 * tm * H * 4


# ---------------------------------------------------------------------------
# pallas_call builder + wrapper
# ---------------------------------------------------------------------------
def _build_call(rows_p, H, tm, x_dtype, nsub, approx_gelu,
                single_buffer_weights, vmem_limit):
    # Weights / packed params never change across the grid -> single-buffer
    # them when the runtime supports Buffered(1).
    w_kw = {"pipeline_mode": pl.Buffered(1)} if single_buffer_weights else {}
    row_spec = pl.BlockSpec((tm, H), lambda i: (i, 0))
    mat_spec = pl.BlockSpec((H, H), lambda i: (0, 0), **w_kw)
    prm_spec = pl.BlockSpec((16, H), lambda i: (0, 0), **w_kw)

    kernel = partial(pattern_kernel, nsub=nsub, approx_gelu=approx_gelu)
    return pl.pallas_call(
        kernel,
        out_shape=jax.ShapeDtypeStruct((rows_p, H), x_dtype),
        grid_spec=pltpu.PrefetchScalarGridSpec(
            num_scalar_prefetch=0,
            grid=(rows_p // tm,),
            in_specs=[row_spec,
                      mat_spec, mat_spec, mat_spec, mat_spec,
                      prm_spec],
            out_specs=row_spec,
        ),
        compiler_params=pltpu.CompilerParams(
            dimension_semantics=("parallel",),
            vmem_limit_bytes=int(vmem_limit),
        ),
    )


def pattern_processor(x, params, *, tm=None, matmul_dtype=jnp.bfloat16,
                      nsub=2, approx_gelu=False):
    """x: (batch, seq, hidden). Returns same shape.

    tm:           row tile (auto-sized to VMEM if None; multiple of 8*nsub).
    matmul_dtype: bf16 (default, f32 accumulation) = native MXU fast path and
                  half the resident weight VMEM; pass jnp.float32 for exact
                  PyTorch numerics.  LayerNorm/GELU math is always f32.
    nsub:         independent row sub-chunks per tile (MXU/VPU overlap).
    approx_gelu:  tanh-approx GELU perf path (numerics-affecting; default off).
    """
    B, S, H = x.shape
    rows = B * S
    # Production contract: prefer H % 128 == 0 (H % 256 on v6e/v7x); pad the
    # hidden dim upstream for lane-dense stores and MXU utilization.

    (w1, b1, g1, be1, w2, b2, g2, be2,
     w3, b3, g3, be3, w4, b4) = params
    mm_dtype = jnp.dtype(matmul_dtype)
    w1, w2, w3, w4 = (w.astype(mm_dtype) for w in (w1, w2, w3, w4))

    # Pack the ten (1,H) bias/gamma/beta rows into one (16,H) slab (single
    # BlockSpec / single DMA instead of ten padded (8,H) tiles).
    vecs = [jnp.asarray(v, jnp.float32).reshape(H)
            for v in (b1, g1, be1, b2, g2, be2, b3, g3, be3, b4)]
    prm = jnp.concatenate(
        [jnp.stack(vecs), jnp.zeros((16 - len(vecs), H), jnp.float32)], axis=0)

    single_buf = _buffered1_supported()
    wbuf = 1 if single_buf else 2
    budget = int(0.85 * _vmem_capacity_bytes())   # <= ~54 MiB on v7x
    x_isz = jnp.dtype(x.dtype).itemsize
    fixed = _fixed_bytes(H, mm_dtype.itemsize, wbuf)

    # Row tile: requested (or 512 bf16 / 256 f32), shrunk to the VMEM budget
    # and the row count, kept a multiple of 8*nsub, and capped so the grid has
    # >= 2 steps when there is enough work (v7x megacore sharding).
    step = 8 * max(1, int(nsub))
    if tm is None:
        tm = 512 if mm_dtype.itemsize <= 2 else 256
    tm = max(step, (int(tm) // step) * step)
    while tm > step and fixed + _tile_bytes(tm, H, x_isz) + (4 << 20) > budget:
        tm -= step
    tm = min(tm, _round_up(rows, step))
    if rows >= 2 * step and _round_up(rows, tm) // tm < 2:
        tm = max(step, _round_up(-(-rows // 2), step))
    rows_p = _round_up(rows, tm)

    vmem_limit = min(budget, fixed + _tile_bytes(tm, H, x_isz) + (8 << 20))
    vmem_limit = max(vmem_limit, 16 << 20)

    # Padded rows are zeros -> LN of a constant is finite (beta) -> sliced off.
    x2 = x.reshape(rows, H)
    if rows_p != rows:
        x2 = jnp.pad(x2, ((0, rows_p - rows), (0, 0)))

    out = _build_call(rows_p, H, tm, x.dtype, nsub, approx_gelu,
                      single_buf, vmem_limit)(x2, w1, w2, w3, w4, prm)
    return out[:rows].reshape(B, S, H)


# ---------------------------------------------------------------------------
# Params + pure-JAX reference (mirrors the PyTorch module)
# ---------------------------------------------------------------------------
def init_params(key, hidden_dim):
    """xavier_normal_(gain=0.5) Linear weights (stored (in,out)), zero biases,
    LayerNorm gamma=1 / beta=0 (PyTorch defaults)."""
    gain = 0.5
    std = gain * math.sqrt(2.0 / (hidden_dim + hidden_dim))
    k1, k2, k3, k4 = jax.random.split(key, 4)

    def lin_w(k):
        return (std * jax.random.normal(k, (hidden_dim, hidden_dim))).astype(jnp.float32)

    zeros_row = jnp.zeros((1, hidden_dim), jnp.float32)
    ones_row = jnp.ones((1, hidden_dim), jnp.float32)

    w1, w2, w3, w4 = lin_w(k1), lin_w(k2), lin_w(k3), lin_w(k4)
    b1 = b2 = b3 = b4 = zeros_row
    g1 = g2 = g3 = ones_row
    be1 = be2 = be3 = zeros_row
    return (w1, b1, g1, be1, w2, b2, g2, be2, w3, b3, g3, be3, w4, b4)


def reference(x, params):
    """Pure-JAX reference of the PyTorch forward pass."""
    (w1, b1, g1, be1, w2, b2, g2, be2,
     w3, b3, g3, be3, w4, b4) = params
    h = _gelu_exact(_layernorm(x @ w1 + b1, g1, be1))
    feat = _layernorm(h @ w2 + b2, g2, be2)
    g = _gelu_exact(_layernorm(feat @ w3 + b3, g3, be3))
    gate = jax.nn.sigmoid(g @ w4 + b4)
    return feat * gate + x


if __name__ == "__main__":
    key = jax.random.PRNGKey(0)
    kx, kp = jax.random.split(key)

    batch, seq, hidden = 2, 8, 32   # small demo; prefer hidden % 128 == 0 in production
    x = jax.random.normal(kx, (batch, seq, hidden), dtype=jnp.float32)
    params = init_params(kp, hidden)

    ref = reference(x.reshape(-1, hidden), params).reshape(batch, seq, hidden)

    # Exact-numerics path (f32 matmuls): matches the PyTorch module.
    out_f32 = jax.block_until_ready(
        pattern_processor(x, params, matmul_dtype=jnp.float32))
    assert out_f32.shape == (batch, seq, hidden)
    assert jnp.allclose(out_f32, ref, atol=1e-4, rtol=1e-4), "f32 mismatch vs reference"

    # Perf default (bf16 matmul inputs, f32 accumulation): relaxed tolerance.
    out_bf16 = jax.block_until_ready(pattern_processor(x, params))
    assert float(jnp.max(jnp.abs(out_bf16 - ref))) < 0.1, "bf16 mismatch vs reference"

    print("KERNEL_OK")
</pallas_src>

<mosaic_0001>
module attributes {stable_mosaic.version = 11 : i64} {
  func.func @k(%arg0: i32, %arg1: memref<8x128xf32, #tpu.memory_space<vmem>>, %arg2: memref<8x128xf32, #tpu.memory_space<vmem>>) attributes {dimension_semantics = [#tpu.dimension_semantics<arbitrary>], iteration_bounds = array<i64: 1>, scalar_prefetch = 0 : i64, scratch_operands = 0 : i64, tpu.core_type = #tpu.core_type<tc>, window_params = [{pipeline_mode = #tpu.pipeline_mode<synchronous>, transform_indices = @transform_0, window_bounds = array<i64: 8, 128>}, {pipeline_mode = #tpu.pipeline_mode<synchronous>, transform_indices = @transform_1, window_bounds = array<i64: 8, 128>}]} {
    %c0 = arith.constant 0 : index
    %c0_0 = arith.constant 0 : index
    %0 = vector.load %arg1[%c0, %c0_0] : memref<8x128xf32, #tpu.memory_space<vmem>>, vector<8x128xf32>
    %cst = arith.constant 1.000000e+00 : f32
    %1 = vector.broadcast %cst : f32 to vector<8x128xf32>
    %2 = arith.addf %0, %1 : vector<8x128xf32>
    %c0_1 = arith.constant 0 : index
    %c0_2 = arith.constant 0 : index
    %3 = vector.load %arg2[%c0_1, %c0_2] : memref<8x128xf32, #tpu.memory_space<vmem>>, vector<8x128xf32>
    tpu.vector_store %arg2[%c0_1, %c0_2], %2 {strides = array<i32>} : memref<8x128xf32, #tpu.memory_space<vmem>>, vector<8x128xf32>,
    return
  }
  func.func @transform_0(%arg0: i32) -> (i32, i32) {
    %c0_i32 = arith.constant 0 : i32
    %c0_i32_0 = arith.constant 0 : i32
    %c0_i32_1 = arith.constant 0 : i32
    return %c0_i32, %c0_i32_0 : i32, i32
  }
  func.func @transform_1(%arg0: i32) -> (i32, i32) {
    %c0_i32 = arith.constant 0 : i32
    %c0_i32_0 = arith.constant 0 : i32
    %c0_i32_1 = arith.constant 0 : i32
    return %c0_i32, %c0_i32_0 : i32, i32
  }
}

module attributes {stable_mosaic.version = 11 : i64} {
  func.func @pattern_kernel(%arg0: i32, %arg1: memref<16x32xf32, #tpu.memory_space<vmem>>, %arg2: memref<32x32xf32, #tpu.memory_space<vmem>>, %arg3: memref<32x32xf32, #tpu.memory_space<vmem>>, %arg4: memref<32x32xf32, #tpu.memory_space<vmem>>, %arg5: memref<32x32xf32, #tpu.memory_space<vmem>>, %arg6: memref<16x32xf32, #tpu.memory_space<vmem>>, %arg7: memref<16x32xf32, #tpu.memory_space<vmem>>) attributes {dimension_semantics = [#tpu.dimension_semantics<parallel>], iteration_bounds = array<i64: 1>, scalar_prefetch = 0 : i64, scratch_operands = 0 : i64, tpu.core_type = #tpu.core_type<tc>, window_params = [{transform_indices = @transform_0, window_bounds = array<i64: 16, 32>}, {pipeline_mode = #tpu.pipeline_mode<synchronous>, transform_indices = @transform_1, window_bounds = array<i64: 32, 32>}, {pipeline_mode = #tpu.pipeline_mode<synchronous>, transform_indices = @transform_2, window_bounds = array<i64: 32, 32>}, {pipeline_mode = #tpu.pipeline_mode<synchronous>, transform_indices = @transform_3, window_bounds = array<i64: 32, 32>}, {pipeline_mode = #tpu.pipeline_mode<synchronous>, transform_indices = @transform_4, window_bounds = array<i64: 32, 32>}, {pipeline_mode = #tpu.pipeline_mode<synchronous>, transform_indices = @transform_5, window_bounds = array<i64: 16, 32>}, {transform_indices = @transform_6, window_bounds = array<i64: 16, 32>}]} {
    %c0 = arith.constant 0 : index
    %c0_0 = arith.constant 0 : index
    %0 = vector.load %arg6[%c0, %c0_0] : memref<16x32xf32, #tpu.memory_space<vmem>>, vector<16x32xf32>
    %1 = vector.extract_strided_slice %0 {offsets = [0, 0], sizes = [1, 32], strides = [1, 1]} : vector<16x32xf32> to vector<1x32xf32>
    %2 = vector.extract_strided_slice %0 {offsets = [1, 0], sizes = [1, 32], strides = [1, 1]} : vector<16x32xf32> to vector<1x32xf32>
    %3 = vector.extract_strided_slice %0 {offsets = [2, 0], sizes = [1, 32], strides = [1, 1]} : vector<16x32xf32> to vector<1x32xf32>
    %4 = vector.extract_strided_slice %0 {offsets = [3, 0], sizes = [1, 32], strides = [1, 1]} : vector<16x32xf32> to vector<1x32xf32>
    %5 = vector.extract_strided_slice %0 {offsets = [4, 0], sizes = [1, 32], strides = [1, 1]} : vector<16x32xf32> to vector<1x32xf32>
    %6 = vector.extract_strided_slice %0 {offsets = [5, 0], sizes = [1, 32], strides = [1, 1]} : vector<16x32xf32> to vector<1x32xf32>
    %7 = vector.extract_strided_slice %0 {offsets = [6, 0], sizes = [1, 32], strides = [1, 1]} : vector<16x32xf32> to vector<1x32xf32>
    %8 = vector.extract_strided_slice %0 {offsets = [7, 0], sizes = [1, 32], strides = [1, 1]} : vector<16x32xf32> to vector<1x32xf32>
    %9 = vector.extract_strided_slice %0 {offsets = [8, 0], sizes = [1, 32], strides = [1, 1]} : vector<16x32xf32> to vector<1x32xf32>
    %10 = vector.extract_strided_slice %0 {offsets = [9, 0], sizes = [1, 32], strides = [1, 1]} : vector<16x32xf32> to vector<1x32xf32>
    %c0_1 = arith.constant 0 : index
    %c0_2 = arith.constant 0 : index
    %11 = vector.load %arg2[%c0_1, %c0_2] : memref<32x32xf32, #tpu.memory_space<vmem>>, vector<32x32xf32>
    %c0_3 = arith.constant 0 : index
    %c0_4 = arith.constant 0 : index
    %12 = vector.load %arg3[%c0_3, %c0_4] : memref<32x32xf32, #tpu.memory_space<vmem>>, vector<32x32xf32>
    %c0_5 = arith.constant 0 : index
    %c0_6 = arith.constant 0 : index
    %13 = vector.load %arg4[%c0_5, %c0_6] : memref<32x32xf32, #tpu.memory_space<vmem>>, vector<32x32xf32>
    %c0_7 = arith.constant 0 : index
    %c0_8 = arith.constant 0 : index
    %14 = vector.load %arg5[%c0_7, %c0_8] : memref<32x32xf32, #tpu.memory_space<vmem>>, vector<32x32xf32>
    %c0_9 = arith.constant 0 : index
    %c0_10 = arith.constant 0 : index
    %15 = vector.load %arg1[%c0_9, %c0_10] : memref<16x32xf32, #tpu.memory_space<vmem>>, vector<8x32xf32>
    %cst = arith.constant dense<0.000000e+00> : vector<8x32xf32>
    %16 = tpu.matmul %15, %11, %cst {dimension_numbers = #tpu.dot_dimension_numbers<[1], [0], [0], [1], [0, 0, 1, 1], [], []>} : vector<8x32xf32>, vector<32x32xf32>, vector<8x32xf32> -> vector<8x32xf32>
    %17 = vector.broadcast %1 : vector<1x32xf32> to vector<8x32xf32>
    %18 = arith.addf %16, %17 : vector<8x32xf32>
    %cst_11 = arith.constant dense<0.000000e+00> : vector<8xf32>
    %19 = vector.multi_reduction <add>, %18, %cst_11 [1] : vector<8x32xf32> to vector<8xf32>
    %20 = vector.shape_cast %19 : vector<8xf32> to vector<8x1xf32>
    %cst_12 = arith.constant 3.200000e+01 : f32
    %21 = vector.broadcast %cst_12 : f32 to vector<8x1xf32>
    %22 = arith.divf %20, %21 : vector<8x1xf32>
    %23 = vector.broadcast %22 : vector<8x1xf32> to vector<8x32xf32>
    %24 = arith.subf %18, %23 : vector<8x32xf32>
    %25 = arith.mulf %24, %24 : vector<8x32xf32>
    %cst_13 = arith.constant dense<0.000000e+00> : vector<8xf32>
    %26 = vector.multi_reduction <add>, %25, %cst_13 [1] : vector<8x32xf32> to vector<8xf32>
    %27 = vector.shape_cast %26 : vector<8xf32> to vector<8x1xf32>
    %cst_14 = arith.constant 3.200000e+01 : f32
    %28 = vector.broadcast %cst_14 : f32 to vector<8x1xf32>
    %29 = arith.divf %27, %28 : vector<8x1xf32>
    %cst_15 = arith.constant 9.99999974E-6 : f32
    %30 = vector.broadcast %cst_15 : f32 to vector<8x1xf32>
    %31 = arith.addf %29, %30 : vector<8x1xf32>
    %32 = math.rsqrt %31 : vector<8x1xf32>
    %33 = vector.broadcast %32 : vector<8x1xf32> to vector<8x32xf32>
    %34 = arith.mulf %24, %33 : vector<8x32xf32>
    %35 = vector.broadcast %2 : vector<1x32xf32> to vector<8x32xf32>
    %36 = arith.mulf %34, %35 : vector<8x32xf32>
    %37 = vector.broadcast %3 : vector<1x32xf32> to vector<8x32xf32>
    %38 = arith.addf %36, %37 : vector<8x32xf32>
    %cst_16 = arith.constant 5.000000e-01 : f32
    %39 = vector.broadcast %cst_16 : f32 to vector<8x32xf32>
    %40 = arith.mulf %39, %38 : vector<8x32xf32>
    %cst_17 = arith.constant 0.707106769 : f32
    %41 = vector.broadcast %cst_17 : f32 to vector<8x32xf32>
    %42 = arith.mulf %38, %41 : vector<8x32xf32>
    %43 = math.erf %42 : vector<8x32xf32>
    %cst_18 = arith.constant 1.000000e+00 : f32
    %44 = vector.broadcast %cst_18 : f32 to vector<8x32xf32>
    %45 = arith.addf %44, %43 : vector<8x32xf32>
    %46 = arith.mulf %40, %45 : vector<8x32xf32>
    %cst_19 = arith.constant dense<0.000000e+00> : vector<8x32xf32>
    %47 = tpu.matmul %46, %12, %cst_19 {dimension_numbers = #tpu.dot_dimension_numbers<[1], [0], [0], [1], [0, 0, 1, 1], [], []>} : vector<8x32xf32>, vector<32x32xf32>, vector<8x32xf32> -> vector<8x32xf32>
    %48 = vector.broadcast %4 : vector<1x32xf32> to vector<8x32xf32>
    %49 = arith.addf %47, %48 : vector<8x32xf32>
    %cst_20 = arith.constant dense<0.000000e+00> : vector<8xf32>
    %50 = vector.multi_reduction <add>, %49, %cst_20 [1] : vector<8x32xf32> to vector<8xf32>
    %51 = vector.shape_cast %50 : vector<8xf32> to vector<8x1xf32>
    %cst_21 = arith.constant 3.200000e+01 : f32
    %52 = vector.broadcast %cst_21 : f32 to vector<8x1xf32>
    %53 = arith.divf %51, %52 : vector<8x1xf32>
    %54 = vector.broadcast %53 : vector<8x1xf32> to vector<8x32xf32>
    %55 = arith.subf %49, %54 : vector<8x32xf32>
    %56 = arith.mulf %55, %55 : vector<8x32xf32>
    %cst_22 = arith.constant dense<0.000000e+00> : vector<8xf32>
    %57 = vector.multi_reduction <add>, %56, %cst_22 [1] : vector<8x32xf32> to vector<8xf32>
    %58 = vector.shape_cast %57 : vector<8xf32> to vector<8x1xf32>
    %cst_23 = arith.constant 3.200000e+01 : f32
    %59 = vector.broadcast %cst_23 : f32 to vector<8x1xf32>
    %60 = arith.divf %58, %59 : vector<8x1xf32>
    %cst_24 = arith.constant 9.99999974E-6 : f32
    %61 = vector.broadcast %cst_24 : f32 to vector<8x1xf32>
    %62 = arith.addf %60, %61 : vector<8x1xf32>
    %63 = math.rsqrt %62 : vector<8x1xf32>
    %64 = vector.broadcast %63 : vector<8x1xf32> to vector<8x32xf32>
    %65 = arith.mulf %55, %64 : vector<8x32xf32>
    %66 = vector.broadcast %5 : vector<1x32xf32> to vector<8x32xf32>
    %67 = arith.mulf %65, %66 : vector<8x32xf32>
    %68 = vector.broadcast %6 : vector<1x32xf32> to vector<8x32xf32>
    %69 = arith.addf %67, %68 : vector<8x32xf32>
    %cst_25 = arith.constant dense<0.000000e+00> : vector<8x32xf32>
    %70 = tpu.matmul %69, %13, %cst_25 {dimension_numbers = #tpu.dot_dimension_numbers<[1], [0], [0], [1], [0, 0, 1, 1], [], []>} : vector<8x32xf32>, vector<32x32xf32>, vector<8x32xf32> -> vector<8x32xf32>
    %71 = vector.broadcast %7 : vector<1x32xf32> to vector<8x32xf32>
    %72 = arith.addf %70, %71 : vector<8x32xf32>
    %cst_26 = arith.constant dense<0.000000e+00> : vector<8xf32>
    %73 = vector.multi_reduction <add>, %72, %cst_26 [1] : vector<8x32xf32> to vector<8xf32>
    %74 = vector.shape_cast %73 : vector<8xf32> to vector<8x1xf32>
    %cst_27 = arith.constant 3.200000e+01 : f32
    %75 = vector.broadcast %cst_27 : f32 to vector<8x1xf32>
    %76 = arith.divf %74, %75 : vector<8x1xf32>
    %77 = vector.broadcast %76 : vector<8x1xf32> to vector<8x32xf32>
    %78 = arith.subf %72, %77 : vector<8x32xf32>
    %79 = arith.mulf %78, %78 : vector<8x32xf32>
    %cst_28 = arith.constant dense<0.000000e+00> : vector<8xf32>
    %80 = vector.multi_reduction <add>, %79, %cst_28 [1] : vector<8x32xf32> to vector<8xf32>
    %81 = vector.shape_cast %80 : vector<8xf32> to vector<8x1xf32>
    %cst_29 = arith.constant 3.200000e+01 : f32
    %82 = vector.broadcast %cst_29 : f32 to vector<8x1xf32>
    %83 = arith.divf %81, %82 : vector<8x1xf32>
    %cst_30 = arith.constant 9.99999974E-6 : f32
    %84 = vector.broadcast %cst_30 : f32 to vector<8x1xf32>
    %85 = arith.addf %83, %84 : vector<8x1xf32>
    %86 = math.rsqrt %85 : vector<8x1xf32>
    %87 = vector.broadcast %86 : vector<8x1xf32> to vector<8x32xf32>
    %88 = arith.mulf %78, %87 : vector<8x32xf32>
    %89 = vector.broadcast %8 : vector<1x32xf32> to vector<8x32xf32>
    %90 = arith.mulf %88, %89 : vector<8x32xf32>
    %91 = vector.broadcast %9 : vector<1x32xf32> to vector<8x32xf32>
    %92 = arith.addf %90, %91 : vector<8x32xf32>
    %cst_31 = arith.constant 5.000000e-01 : f32
    %93 = vector.broadcast %cst_31 : f32 to vector<8x32xf32>
    %94 = arith.mulf %93, %92 : vector<8x32xf32>
    %cst_32 = arith.constant 0.707106769 : f32
    %95 = vector.broadcast %cst_32 : f32 to vector<8x32xf32>
    %96 = arith.mulf %92, %95 : vector<8x32xf32>
    %97 = math.erf %96 : vector<8x32xf32>
    %cst_33 = arith.constant 1.000000e+00 : f32
    %98 = vector.broadcast %cst_33 : f32 to vector<8x32xf32>
    %99 = arith.addf %98, %97 : vector<8x32xf32>
    %100 = arith.mulf %94, %99 : vector<8x32xf32>
    %cst_34 = arith.constant dense<0.000000e+00> : vector<8x32xf32>
    %101 = tpu.matmul %100, %14, %cst_34 {dimension_numbers = #tpu.dot_dimension_numbers<[1], [0], [0], [1], [0, 0, 1, 1], [], []>} : vector<8x32xf32>, vector<32x32xf32>, vector<8x32xf32> -> vector<8x32xf32>
    %102 = vector.broadcast %10 : vector<1x32xf32> to vector<8x32xf32>
    %103 = arith.addf %101, %102 : vector<8x32xf32>
    %104 = arith.negf %103 : vector<8x32xf32>
    %105 = math.exp %104 : vector<8x32xf32>
    %cst_35 = arith.constant 1.000000e+00 : f32
    %106 = vector.broadcast %cst_35 : f32 to vector<8x32xf32>
    %107 = arith.addf %106, %105 : vector<8x32xf32>
    %108 = arith.divf %106, %107 : vector<8x32xf32>
    %109 = arith.mulf %69, %108 : vector<8x32xf32>
    %110 = arith.addf %109, %15 : vector<8x32xf32>
    %c0_36 = arith.constant 0 : index
    %c0_37 = arith.constant 0 : index
    %111 = vector.load %arg7[%c0_36, %c0_37] : memref<16x32xf32, #tpu.memory_space<vmem>>, vector<8x32xf32>
    tpu.vector_store %arg7[%c0_36, %c0_37], %110 {strides = array<i32>} : memref<16x32xf32, #tpu.memory_space<vmem>>, vector<8x32xf32>,
    %c8 = arith.constant 8 : index
    %c0_38 = arith.constant 0 : index
    %112 = vector.load %arg1[%c8, %c0_38] : memref<16x32xf32, #tpu.memory_space<vmem>>, vector<8x32xf32>
    %cst_39 = arith.constant dense<0.000000e+00> : vector<8x32xf32>
    %113 = tpu.matmul %112, %11, %cst_39 {dimension_numbers = #tpu.dot_dimension_numbers<[1], [0], [0], [1], [0, 0, 1, 1], [], []>} : vector<8x32xf32>, vector<32x32xf32>, vector<8x32xf32> -> vector<8x32xf32>
    %114 = vector.broadcast %1 : vector<1x32xf32> to vector<8x32xf32>
    %115 = arith.addf %113, %114 : vector<8x32xf32>
    %cst_40 = arith.constant dense<0.000000e+00> : vector<8xf32>
    %116 = vector.multi_reduction <add>, %115, %cst_40 [1] : vector<8x32xf32> to vector<8xf32>
    %117 = vector.shape_cast %116 : vector<8xf32> to vector<8x1xf32>
    %cst_41 = arith.constant 3.200000e+01 : f32
    %118 = vector.broadcast %cst_41 : f32 to vector<8x1xf32>
    %119 = arith.divf %117, %118 : vector<8x1xf32>
    %120 = vector.broadcast %119 : vector<8x1xf32> to vector<8x32xf32>
    %121 = arith.subf %115, %120 : vector<8x32xf32>
    %122 = arith.mulf %121, %121 : vector<8x32xf32>
    %cst_42 = arith.constant dense<0.000000e+00> : vector<8xf32>
    %123 = vector.multi_reduction <add>, %122, %cst_42 [1] : vector<8x32xf32> to vector<8xf32>
    %124 = vector.shape_cast %123 : vector<8xf32> to vector<8x1xf32>
    %cst_43 = arith.constant 3.200000e+01 : f32
    %125 = vector.broadcast %cst_43 : f32 to vector<8x1xf32>
    %126 = arith.divf %124, %125 : vector<8x1xf32>
    %cst_44 = arith.constant 9.99999974E-6 : f32
    %127 = vector.broadcast %cst_44 : f32 to vector<8x1xf32>
    %128 = arith.addf %126, %127 : vector<8x1xf32>
    %129 = math.rsqrt %128 : vector<8x1xf32>
    %130 = vector.broadcast %129 : vector<8x1xf32> to vector<8x32xf32>
    %131 = arith.mulf %121, %130 : vector<8x32xf32>
    %132 = vector.broadcast %2 : vector<1x32xf32> to vector<8x32xf32>
    %133 = arith.mulf %131, %132 : vector<8x32xf32>
    %134 = vector.broadcast %3 : vector<1x32xf32> to vector<8x32xf32>
    %135 = arith.addf %133, %134 : vector<8x32xf32>
    %cst_45 = arith.constant 5.000000e-01 : f32
    %136 = vector.broadcast %cst_45 : f32 to vector<8x32xf32>
    %137 = arith.mulf %136, %135 : vector<8x32xf32>
    %cst_46 = arith.constant 0.707106769 : f32
    %138 = vector.broadcast %cst_46 : f32 to vector<8x32xf32>
    %139 = arith.mulf %135, %138 : vector<8x32xf32>
    %140 = math.erf %139 : vector<8x32xf32>
    %cst_47 = arith.constant 1.000000e+00 : f32
    %141 = vector.broadcast %cst_47 : f32 to vector<8x32xf32>
    %142 = arith.addf %141, %140 : vector<8x32xf32>
    %143 = arith.mulf %137, %142 : vector<8x32xf32>
    %cst_48 = arith.constant dense<0.000000e+00> : vector<8x32xf32>
    %144 = tpu.matmul %143, %12, %cst_48 {dimension_numbers = #tpu.dot_dimension_numbers<[1], [0], [0], [1], [0, 0, 1, 1], [], []>} : vector<8x32xf32>, vector<32x32xf32>, vector<8x32xf32> -> vector<8x32xf32>
    %145 = vector.broadcast %4 : vector<1x32xf32> to vector<8x32xf32>
    %146 = arith.addf %144, %145 : vector<8x32xf32>
    %cst_49 = arith.constant dense<0.000000e+00> : vector<8xf32>
    %147 = vector.multi_reduction <add>, %146, %cst_49 [1] : vector<8x32xf32> to vector<8xf32>
    %148 = vector.shape_cast %147 : vector<8xf32> to vector<8x1xf32>
    %cst_50 = arith.constant 3.200000e+01 : f32
    %149 = vector.broadcast %cst_50 : f32 to vector<8x1xf32>
    %150 = arith.divf %148, %149 : vector<8x1xf32>
    %151 = vector.broadcast %150 : vector<8x1xf32> to vector<8x32xf32>
    %152 = arith.subf %146, %151 : vector<8x32xf32>
    %153 = arith.mulf %152, %152 : vector<8x32xf32>
    %cst_51 = arith.constant dense<0.000000e+00> : vector<8xf32>
    %154 = vector.multi_reduction <add>, %153, %cst_51 [1] : vector<8x32xf32> to vector<8xf32>
    %155 = vector.shape_cast %154 : vector<8xf32> to vector<8x1xf32>
    %cst_52 = arith.constant 3.200000e+01 : f32
    %156 = vector.broadcast %cst_52 : f32 to vector<8x1xf32>
    %157 = arith.divf %155, %156 : vector<8x1xf32>
    %cst_53 = arith.constant 9.99999974E-6 : f32
    %158 = vector.broadcast %cst_53 : f32 to vector<8x1xf32>
    %159 = arith.addf %157, %158 : vector<8x1xf32>
    %160 = math.rsqrt %159 : vector<8x1xf32>
    %161 = vector.broadcast %160 : vector<8x1xf32> to vector<8x32xf32>
    %162 = arith.mulf %152, %161 : vector<8x32xf32>
    %163 = vector.broadcast %5 : vector<1x32xf32> to vector<8x32xf32>
    %164 = arith.mulf %162, %163 : vector<8x32xf32>
    %165 = vector.broadcast %6 : vector<1x32xf32> to vector<8x32xf32>
    %166 = arith.addf %164, %165 : vector<8x32xf32>
    %cst_54 = arith.constant dense<0.000000e+00> : vector<8x32xf32>
    %167 = tpu.matmul %166, %13, %cst_54 {dimension_numbers = #tpu.dot_dimension_numbers<[1], [0], [0], [1], [0, 0, 1, 1], [], []>} : vector<8x32xf32>, vector<32x32xf32>, vector<8x32xf32> -> vector<8x32xf32>
    %168 = vector.broadcast %7 : vector<1x32xf32> to vector<8x32xf32>
    %169 = arith.addf %167, %168 : vector<8x32xf32>
    %cst_55 = arith.constant dense<0.000000e+00> : vector<8xf32>
    %170 = vector.multi_reduction <add>, %169, %cst_55 [1] : vector<8x32xf32> to vector<8xf32>
    %171 = vector.shape_cast %170 : vector<8xf32> to vector<8x1xf32>
    %cst_56 = arith.constant 3.200000e+01 : f32
    %172 = vector.broadcast %cst_56 : f32 to vector<8x1xf32>
    %173 = arith.divf %171, %172 : vector<8x1xf32>
    %174 = vector.broadcast %173 : vector<8x1xf32> to vector<8x32xf32>
    %175 = arith.subf %169, %174 : vector<8x32xf32>
    %176 = arith.mulf %175, %175 : vector<8x32xf32>
    %cst_57 = arith.constant dense<0.000000e+00> : vector<8xf32>
    %177 = vector.multi_reduction <add>, %176, %cst_57 [1] : vector<8x32xf32> to vector<8xf32>
    %178 = vector.shape_cast %177 : vector<8xf32> to vector<8x1xf32>
    %cst_58 = arith.constant 3.200000e+01 : f32
    %179 = vector.broadcast %cst_58 : f32 to vector<8x1xf32>
    %180 = arith.divf %178, %179 : vector<8x1xf32>
    %cst_59 = arith.constant 9.99999974E-6 : f32
    %181 = vector.broadcast %cst_59 : f32 to vector<8x1xf32>
    %182 = arith.addf %180, %181 : vector<8x1xf32>
    %183 = math.rsqrt %182 : vector<8x1xf32>
    %184 = vector.broadcast %183 : vector<8x1xf32> to vector<8x32xf32>
    %185 = arith.mulf %175, %184 : vector<8x32xf32>
    %186 = vector.broadcast %8 : vector<1x32xf32> to vector<8x32xf32>
    %187 = arith.mulf %185, %186 : vector<8x32xf32>
    %188 = vector.broadcast %9 : vector<1x32xf32> to vector<8x32xf32>
    %189 = arith.addf %187, %188 : vector<8x32xf32>
    %cst_60 = arith.constant 5.000000e-01 : f32
    %190 = vector.broadcast %cst_60 : f32 to vector<8x32xf32>
    %191 = arith.mulf %190, %189 : vector<8x32xf32>
    %cst_61 = arith.constant 0.707106769 : f32
    %192 = vector.broadcast %cst_61 : f32 to vector<8x32xf32>
    %193 = arith.mulf %189, %192 : vector<8x32xf32>
    %194 = math.erf %193 : vector<8x32xf32>
    %cst_62 = arith.constant 1.000000e+00 : f32
    %195 = vector.broadcast %cst_62 : f32 to vector<8x32xf32>
    %196 = arith.addf %195, %194 : vector<8x32xf32>
    %197 = arith.mulf %191, %196 : vector<8x32xf32>
    %cst_63 = arith.constant dense<0.000000e+00> : vector<8x32xf32>
    %198 = tpu.matmul %197, %14, %cst_63 {dimension_numbers = #tpu.dot_dimension_numbers<[1], [0], [0], [1], [0, 0, 1, 1], [], []>} : vector<8x32xf32>, vector<32x32xf32>, vector<8x32xf32> -> vector<8x32xf32>
    %199 = vector.broadcast %10 : vector<1x32xf32> to vector<8x32xf32>
    %200 = arith.addf %198, %199 : vector<8x32xf32>
    %201 = arith.negf %200 : vector<8x32xf32>
    %202 = math.exp %201 : vector<8x32xf32>
    %cst_64 = arith.constant 1.000000e+00 : f32
    %203 = vector.broadcast %cst_64 : f32 to vector<8x32xf32>
    %204 = arith.addf %203, %202 : vector<8x32xf32>
    %205 = arith.divf %203, %204 : vector<8x32xf32>
    %206 = arith.mulf %166, %205 : vector<8x32xf32>
    %207 = arith.addf %206, %112 : vector<8x32xf32>
    %c8_65 = arith.constant 8 : index
    %c0_66 = arith.constant 0 : index
    %208 = vector.load %arg7[%c8_65, %c0_66] : memref<16x32xf32, #tpu.memory_space<vmem>>, vector<8x32xf32>
    tpu.vector_store %arg7[%c8_65, %c0_66], %207 {strides = array<i32>} : memref<16x32xf32, #tpu.memory_space<vmem>>, vector<8x32xf32>,
    return
  }
  func.func @transform_0(%arg0: i32) -> (i32, i32) {
    %c0_i32 = arith.constant 0 : i32
    %c0_i32_0 = arith.constant 0 : i32
    return %arg0, %c0_i32 : i32, i32
  }
  func.func @transform_1(%arg0: i32) -> (i32, i32) {
    %c0_i32 = arith.constant 0 : i32
    %c0_i32_0 = arith.constant 0 : i32
    %c0_i32_1 = arith.constant 0 : i32
    return %c0_i32, %c0_i32_0 : i32, i32
  }
  func.func @transform_2(%arg0: i32) -> (i32, i32) {
    %c0_i32 = arith.constant 0 : i32
    %c0_i32_0 = arith.constant 0 : i32
    %c0_i32_1 = arith.constant 0 : i32
    return %c0_i32, %c0_i32_0 : i32, i32
  }
  func.func @transform_3(%arg0: i32) -> (i32, i32) {
    %c0_i32 = arith.constant 0 : i32
    %c0_i32_0 = arith.constant 0 : i32
    %c0_i32_1 = arith.constant 0 : i32
    return %c0_i32, %c0_i32_0 : i32, i32
  }
  func.func @transform_4(%arg0: i32) -> (i32, i32) {
    %c0_i32 = arith.constant 0 : i32
    %c0_i32_0 = arith.constant 0 : i32
    %c0_i32_1 = arith.constant 0 : i32
    return %c0_i32, %c0_i32_0 : i32, i32
  }
  func.func @transform_5(%arg0: i32) -> (i32, i32) {
    %c0_i32 = arith.constant 0 : i32
    %c0_i32_0 = arith.constant 0 : i32
    %c0_i32_1 = arith.constant 0 : i32
    return %c0_i32, %c0_i32_0 : i32, i32
  }
  func.func @transform_6(%arg0: i32) -> (i32, i32) {
    %c0_i32 = arith.constant 0 : i32
    %c0_i32_0 = arith.constant 0 : i32
    return %arg0, %c0_i32 : i32, i32
  }
}

</mosaic_0001>

<bundles_post_ra>
// kernel: tpu_custom_call.1
= control target key start
LH: loop header
LB: loop body
LE: loop exit
PB: predicated region body
PF: predicated region fallthrough
CT: control target
= control target key end

     0   :  { %6 = vsyncpa [#allocation3], 0  ;;  %s115_s0 = inlined_call_operand.hbm [shape: f32[8,128], index: 0, kind: input, shape index: {}]   ;;  %s116_s1 = inlined_call_operand.hbm [shape: f32[8,128], index: 1, kind: output, shape index: {}]  }
   0x1   :  { %7 = vsyncpa [#allocation4], 0  ;;  %s13_s8 = sshll.u32 %s115_s0, 4  ;;  %s97_s9 = smov [#allocation2]   ;;  %s14_s8 = int_to_ptr.hbm [resolvable:$true] %s13_s8 }
   0x2   :  { %s15_s10 = sshll.u32 %s97_s9, 4  ;;  %s16_s10 = int_to_ptr.vmem [resolvable:$true] %s15_s10 }
   0x3   :  { %18 = dma.hbm_to_vmem [thread:$0]  %s14_s8, 128, %s16_s10, [#allocation3]  }
   0x4   :  { %93 = dma.done.wait [#allocation3], 128  }
   0x5   :  { %94 = vsyncadd [#allocation3], 4294967168  ;;  %s98_s11 = smov [#allocation5]   ;;  %s33_s15 = sshll.u32 %s116_s1, 4  ;;  %v23_v0 = vld [vmem:[#allocation2] sm:$0xff]  ;;  %s34_s15 = int_to_ptr.hbm [resolvable:$true] %s33_s15 }
   0x6   :  { %s31_s12 = sshll.u32 %s98_s11, 4  ;;  %v24_v1 = vadd.f32 1.0, %v23_v0  ;;  %s32_s12 = int_to_ptr.vmem [resolvable:$true] %s31_s12 }
   0x8   :  { %25 = vst [vmem:[#allocation5] sm:$0xff] %v24_v1 }
   0x9   :  { %36 = dma.vmem_to_hbm [thread:$0]  %s32_s12, 128, %s34_s15, [#allocation4]  }
   0xa   :  { %95 = dma.done.wait [#allocation4], 128  }
   0xb   :  { %96 = vsyncadd [#allocation4], 4294967168 }
   0xc   :  { %41 = vsyncpa [#allocation3], 1 }
   0xd   :  { %42 = vsyncpa [#allocation4], 1 }

// kernel: tpu_custom_call.1
= control target key start
LH: loop header
LB: loop body
LE: loop exit
PB: predicated region body
PF: predicated region fallthrough
CT: control target
= control target key end

     0   :  { %11 = vsyncpa [#allocation3], 0  ;;  %s1142_s0 = inlined_call_operand.hbm [shape: f32[16,32], index: 0, kind: input, shape index: {}]   ;;  %s1143_s1 = inlined_call_operand.hbm [shape: f32[32,32], index: 1, kind: input, shape index: {}]   ;;  %s1144_s2 = inlined_call_operand.hbm [shape: f32[32,32], index: 2, kind: input, shape index: {}]   ;;  %s1145_s3 = inlined_call_operand.hbm [shape: f32[32,32], index: 3, kind: input, shape index: {}]   ;;  %s1146_s4 = inlined_call_operand.hbm [shape: f32[32,32], index: 4, kind: input, shape index: {}]   ;;  %s1147_s5 = inlined_call_operand.hbm [shape: f32[16,32], index: 5, kind: input, shape index: {}]   ;;  %s1148_s6 = inlined_call_operand.hbm [shape: f32[16,32], index: 6, kind: output, shape index: {}]  }
   0x1   :  { %12 = vsyncpa [#allocation6], 0 }
   0x2   :  { %13 = vsyncpa [#allocation9], 0 }
   0x3   :  { %14 = vsyncpa [#allocation12], 0 }
   0x4   :  { %15 = vsyncpa [#allocation4], 0  ;;  %s33_s23 = sshll.u32 %s1143_s1, 4  ;;  %s958_s24 = smov [#allocation5]   ;;  %s34_s23 = int_to_ptr.hbm [resolvable:$true] %s33_s23 }
   0x5   :  { %s35_s25 = sshll.u32 %s958_s24, 4  ;;  %s59_s28 = sshll.u32 %s1145_s3, 4  ;;  %s36_s25 = int_to_ptr.vmem [resolvable:$true] %s35_s25  ;;  %s60_s28 = int_to_ptr.hbm [resolvable:$true] %s59_s28 }
   0x6   :  { %s959_s29 = smov 128   ;;  %s960_s30 = smov 8  }
   0x7   :  { %41 = dma.hbm_to_vmem [thread:$0]  %s34_s23, 512, %s36_s25, [#allocation6], %s959_s29, %s959_s29, %s960_s30  }
   0x8   :  { %s961_s7 = smov [#allocation8]   ;;  %s20_s1 = sshll.u32 %s1142_s0, 4  ;;  %s21_s1 = int_to_ptr.hbm [resolvable:$true] %s20_s1 }
   0x9   :  { %s61_s8 = sshll.u32 %s961_s7, 4  ;;  %s46_s12 = sshll.u32 %s1144_s2, 4  ;;  %s62_s8 = int_to_ptr.vmem [resolvable:$true] %s61_s8  ;;  %s47_s12 = int_to_ptr.hbm [resolvable:$true] %s46_s12 }
   0xa   :  { %67 = dma.hbm_to_vmem [thread:$0]  %s60_s28, 512, %s62_s8, [#allocation9], %s959_s29, %s959_s29, %s960_s30  }
   0xb   :  { %s962_s13 = smov [#allocation2]   ;;  %s963_s15 = smov [#allocation7]  }
   0xc   :  { %s22_s14 = sshll.u32 %s962_s13, 4  ;;  %s48_s0 = sshll.u32 %s963_s15, 4  ;;  %s23_s14 = int_to_ptr.vmem [resolvable:$true] %s22_s14  ;;  %s49_s0 = int_to_ptr.vmem [resolvable:$true] %s48_s0 }
   0xd   :  { %28 = dma.hbm_to_vmem [thread:$0]  %s21_s1, 256, %s23_s14, [#allocation3], %s959_s29, %s959_s29, %s960_s30  }
   0xe   :  { %s72_s18 = sshll.u32 %s1146_s4, 4  ;;  %s85_s20 = sshll.u32 %s1147_s5, 4  ;;  %s73_s18 = int_to_ptr.hbm [resolvable:$true] %s72_s18  ;;  %s86_s20 = int_to_ptr.hbm [resolvable:$true] %s85_s20 }
   0xf   :  { %54 = dma.hbm_to_vmem [thread:$0]  %s47_s12, 512, %s49_s0, [#allocation6], %s959_s29, %s959_s29, %s960_s30  }
  0x10   :  { %s964_s21 = smov [#allocation10]   ;;  %s965_s23 = smov [#allocation11]  }
  0x11   :  { %s74_s22 = sshll.u32 %s964_s21, 4  ;;  %s87_s4 = sshll.u32 %s965_s23, 4  ;;  %s75_s22 = int_to_ptr.vmem [resolvable:$true] %s74_s22  ;;  %s88_s4 = int_to_ptr.vmem [resolvable:$true] %s87_s4 }
  0x12   :  { %80 = dma.hbm_to_vmem [thread:$0]  %s73_s18, 512, %s75_s22, [#allocation9], %s959_s29, %s959_s29, %s960_s30  }
  0x13   :  { %93 = dma.hbm_to_vmem [thread:$0]  %s86_s20, 256, %s88_s4, [#allocation12], %s959_s29, %s959_s29, %s960_s30  }
  0x14   :  { %948 = dma.done.wait [#allocation3], 256  }
  0x15   :  { %949 = vsyncadd [#allocation3], 4294967040 }
  0x16   :  { %950 = dma.done.wait [#allocation6], 1024  }
  0x17   :  { %951 = vsyncadd [#allocation6], 4294966272 }
  0x18   :  { %952 = dma.done.wait [#allocation9], 1024  }
  0x19   :  { %953 = vsyncadd [#allocation9], 4294966272 }
  0x1a   :  { %954 = dma.done.wait [#allocation12], 256  }
  0x1b   :  { %955 = vsyncadd [#allocation12], 4294967040  ;;  %v123_v0 = vld [vmem:[#allocation5 + $0x18] sm:$0xff]  ;;  %v122_v1 = vld [vmem:[#allocation5 + $0x10] sm:$0xff]  ;;  %vm138_vm0 = vcmask 261120   ;;  %v966_v14 = vmov 32.0  }
  0x1c   :  { %154 = vmatpush.msra.mxu0 %v123_v0  ;;  %v121_v2 = vld [vmem:[#allocation5 + $0x8] sm:$0xff]  ;;  %v120_v3 = vld [vmem:[#allocation5] sm:$0xff]  ;;  %v1039_v4 = vld [vmem:[#allocation2] sm:$0xff]  ;;  %750 = vrcp.f32 %v966_v14  ;;  %s967_s5 = smov [#allocation13]   ;;  %s710_s27 = sshll.u32 %s1148_s6, 4  ;;  %s711_s27 = int_to_ptr.hbm [resolvable:$true] %s710_s27 }
  0x1d   :  { %v1043_v5 = vld [vmem:[#allocation2 + $0x8] sm:$0xff]  ;;  %v1047_v6 = vld [vmem:[#allocation11] sm:$0xff]  ;;  %v126_v34 = vld [vmem:[#allocation7 + $0x10] sm:$0xff]  ;;  %s708_s24 = sshll.u32 %s967_s5, 4  ;;  %s709_s24 = int_to_ptr.vmem [resolvable:$true] %s708_s24 }
  0x1e   :  { %155 = vmatpush.msra.mxu0 %v122_v1  ;;  %v137_v7 = vperm.slane %v1047_v6, 0  ;;  %v127_v33 = vld [vmem:[#allocation7 + $0x18] sm:$0xff]  ;;  %v125_v36 = vld [vmem:[#allocation7 + $0x8] sm:$0xff]  ;;  %v124_v37 = vld [vmem:[#allocation7] sm:$0xff]  ;;  %v191_v49 = vperm.slane %v1047_v6, 1  ;;  %v193_v53 = vperm.slane %v1047_v6, 2 }
  0x1f   :  { %255 = vmatpush.msra.mxu1 %v127_v33 }
  0x20   :  { %156 = vmatpush.msra.mxu0 %v121_v2 }
  0x21   :  { %256 = vmatpush.msra.mxu1 %v126_v34 }
  0x22   :  { %157 = vmatpush.msra.mxu0 %v120_v3  ;;  %v751_v15 = vpop.eup %750 }
  0x23   :  { %726 = vmatmul.msk.f32.vlgmr.msra.gmra.mxu0 %vm138_vm0, %v1039_v4  ;;  %v166_v16 = vmul.f32 32.0, %v751_v15  ;;  %vm170_vm1 = vweird.f32 %v751_v15  ;;  %257 = vmatpush.msra.mxu1 %v125_v36 }
  0x24   :  { %445 = vmatpush.msrb.mxu0 %v123_v0 }
  0x25   :  { %v167_v17 = vsub.f32 1.0, %v166_v16  ;;  %258 = vmatpush.msra.mxu1 %v124_v37 }
  0x26   :  { %446 = vmatpush.msrb.mxu0 %v122_v1 }
  0x27   :  { %v168_v18 = vmul.f32 %v751_v15, %v167_v17  ;;  %536 = vmatpush.msrb.mxu1 %v127_v33 }
  0x28   :  { %447 = vmatpush.msrb.mxu0 %v121_v2 }
  0x29   :  { %v169_v19 = vadd.f32 %v751_v15, %v168_v18  ;;  %537 = vmatpush.msrb.mxu1 %v126_v34 }
  0x2a   :  { %448 = vmatpush.msrb.mxu0 %v120_v3 }
  0x2b   :  { %733 = vmatmul.msk.f32.vlgmr.msrb.gmra.mxu0 %vm138_vm0, %v1043_v5  ;;  %v1052_v20 = vsel %vm170_vm1, %v751_v15, %v169_v19  ;;  %538 = vmatpush.msrb.mxu1 %v125_v36 }
  0x2d   :  { %539 = vmatpush.msrb.mxu1 %v124_v37 }
  0xa0   :  { %v159_v8 = vpop.f32.mrf.mxu0 }
  0xa1   :  { %v160_v9 = vadd.f32 %v159_v8, %v137_v7 }
  0xa3   :  { %v162_v10 = vsel %vm138_vm0, %v160_v9, 0.0 }
  0xa4   :  { %163 = vadd.xlane.f32.xlu0 %v162_v10 }
  0xa8   :  { %v450_v11 = vpop.f32.mrf.mxu0 }
  0xa9   :  { %v451_v12 = vadd.f32 %v450_v11, %v137_v7 }
  0xab   :  { %v453_v13 = vsel %vm138_vm0, %v451_v12, 0.0 }
  0xac   :  { %454 = vadd.xlane.f32.xlu0 %v453_v13 }
 0x117   :  { %v164_v21 = vpop.xlane.xlu0 %163 }
 0x118   :  { %v172_v22 = vmul.f32 %v1052_v20, %v164_v21 }
 0x11a   :  { %v173_v23 = vsub.f32 %v160_v9, %v172_v22 }
 0x11c   :  { %v174_v24 = vmul.f32 %v173_v23, %v173_v23 }
 0x11e   :  { %v175_v25 = vsel %vm138_vm0, %v174_v24, 0.0 }
 0x11f   :  { %176 = vadd.xlane.f32.xlu1 %v175_v25  ;;  %v455_v26 = vpop.xlane.xlu0 %454 }
 0x120   :  { %v456_v27 = vmul.f32 %v455_v26, %v1052_v20 }
 0x122   :  { %v457_v28 = vsub.f32 %v451_v12, %v456_v27 }
 0x124   :  { %v458_v29 = vmul.f32 %v457_v28, %v457_v28 }
 0x126   :  { %v459_v30 = vsel %vm138_vm0, %v458_v29, 0.0 }
 0x127   :  { %460 = vadd.xlane.f32.xlu1 %v459_v30 }
 0x192   :  { %v177_v31 = vpop.xlane.xlu1 %176 }
 0x193   :  { %v178_v32 = vmul.f32 %v177_v31, %v1052_v20 }
 0x195   :  { %v179_v35 = vadd.f32 1e-05, %v178_v32 }
 0x197   :  { %752 = vrsqrt.f32 %v179_v35  ;;  %vm186_vm3 = vweird.f32 %v179_v35 }
 0x19a   :  { %v461_v38 = vpop.xlane.xlu1 %460 }
 0x19b   :  { %v462_v39 = vmul.f32 %v461_v38, %v1052_v20 }
 0x19d   :  { %v753_v40 = vpop.eup %752  ;;  %v463_v41 = vadd.f32 1e-05, %v462_v39 }
 0x19e   :  { %v181_v42 = vmul.f32 %v753_v40, %v179_v35  ;;  %vm187_vm2 = vweird.f32 %v753_v40 }
 0x19f   :  { %754 = vrsqrt.f32 %v463_v41  ;;  %vm188_vm4 = vmor %vm186_vm3, %vm187_vm2  ;;  %vm470_vm6 = vweird.f32 %v463_v41 }
 0x1a0   :  { %v182_v43 = vmul.f32 %v753_v40, %v181_v42 }
 0x1a2   :  { %v183_v44 = vmul.f32 0.5, %v182_v43 }
 0x1a4   :  { %v184_v45 = vsub.f32 1.5, %v183_v44 }
 0x1a5   :  { %v755_v46 = vpop.eup %754 }
 0x1a6   :  { %v185_v47 = vmul.f32 %v753_v40, %v184_v45  ;;  %v465_v48 = vmul.f32 %v755_v46, %v463_v41  ;;  %vm471_vm5 = vweird.f32 %v755_v46 }
 0x1a7   :  { %vm472_vm7 = vmor %vm470_vm6, %vm471_vm5 }
 0x1a8   :  { %v189_v50 = vsel %vm188_vm4, %v753_v40, %v185_v47  ;;  %v466_v51 = vmul.f32 %v755_v46, %v465_v48 }
 0x1a9   :  { %v190_v52 = vmul.f32 %v189_v50, %v173_v23 }
 0x1aa   :  { %v467_v54 = vmul.f32 0.5, %v466_v51 }
 0x1ab   :  { %v192_v55 = vmul.f32 %v191_v49, %v190_v52 }
 0x1ac   :  { %v468_v56 = vsub.f32 1.5, %v467_v54 }
 0x1ad   :  { %v1062_v57 = vadd.f32 %v193_v53, %v192_v55 }
 0x1ae   :  { %v469_v58 = vmul.f32 %v755_v46, %v468_v56 }
 0x1af   :  { %v196_v59 = vmul.f32 0.70710677, %v1062_v57 }
 0x1b0   :  { %v473_v60 = vsel %vm472_vm7, %v755_v46, %v469_v58 }
 0x1b1   :  { %v474_v61 = vmul.f32 %v473_v60, %v457_v28  ;;  %v197_v62 = vmul.f32 %v196_v59, %v196_v59 }
 0x1b3   :  { %v475_v63 = vmul.f32 %v474_v61, %v191_v49  ;;  %v198_v0 = vmin.f32 %v197_v62, 16.0 }
 0x1b5   :  { %v199_v1 = vmul.f32 2.1237322e-06, %v198_v0  ;;  %v210_v2 = vmul.f32 3.8918573e-05, %v198_v0  ;;  %v1065_v3 = vadd.f32 %v475_v63, %v193_v53 }
 0x1b7   :  { %v200_v7 = vadd.f32 0.00028619796, %v199_v1  ;;  %v211_v8 = vadd.f32 0.001143296, %v210_v2  ;;  %v1068_v9 = vmul.f32 0.70710677, %v1065_v3 }
 0x1b9   :  { %v201_v10 = vmul.f32 %v200_v7, %v198_v0  ;;  %v212_v11 = vmul.f32 %v211_v8, %v198_v0  ;;  %v479_v12 = vmul.f32 %v1068_v9, %v1068_v9 }
 0x1bb   :  { %v213_v13 = vadd.f32 0.014752088, %v212_v11  ;;  %v202_v14 = vadd.f32 0.0036580483, %v201_v10  ;;  %v480_v15 = vmin.f32 %v479_v12, 16.0  ;;  %v195_v11 = vmul.f32 0.5, %v1062_v57 }
 0x1bc   :  { %v239_v57 = vperm.slane %v1047_v6, 3 }
 0x1bd   :  { %v214_v16 = vmul.f32 %v213_v13, %v198_v0  ;;  %v481_v17 = vmul.f32 2.1237322e-06, %v480_v15  ;;  %v492_v18 = vmul.f32 3.8918573e-05, %v480_v15  ;;  %v203_v21 = vmul.f32 %v202_v14, %v198_v0 }
 0x1bf   :  { %v215_v19 = vadd.f32 0.112945676, %v214_v16  ;;  %v482_v22 = vadd.f32 0.00028619796, %v481_v17  ;;  %v493_v23 = vadd.f32 0.001143296, %v492_v18 }
 0x1c0   :  { %v204_v28 = vadd.f32 0.05243302, %v203_v21  ;;  %v477_v21 = vmul.f32 0.5, %v1065_v3 }
 0x1c1   :  { %v216_v24 = vmul.f32 %v215_v19, %v198_v0  ;;  %v483_v25 = vmul.f32 %v482_v22, %v480_v15  ;;  %v494_v26 = vmul.f32 %v493_v23, %v480_v15 }
 0x1c2   :  { %v205_v34 = vmul.f32 %v204_v28, %v198_v0 }
 0x1c3   :  { %v217_v27 = vadd.f32 0.4994258, %v216_v24  ;;  %v495_v29 = vadd.f32 0.014752088, %v494_v26  ;;  %v484_v31 = vadd.f32 0.0036580483, %v483_v25 }
 0x1c4   :  { %v206_v38 = vadd.f32 0.18741608, %v205_v34 }
 0x1c5   :  { %v218_v30 = vmul.f32 %v217_v27, %v198_v0  ;;  %v496_v32 = vmul.f32 %v495_v29, %v480_v15  ;;  %v485_v36 = vmul.f32 %v484_v31, %v480_v15 }
 0x1c6   :  { %v207_v43 = vmul.f32 %v206_v38, %v198_v0  ;;  %v131_v38 = vld [vmem:[#allocation8 + $0x18] sm:$0xff] }
 0x1c7   :  { %v219_v33 = vadd.f32 1.0, %v218_v30  ;;  %v497_v35 = vadd.f32 0.112945676, %v496_v32  ;;  %v486_v40 = vadd.f32 0.05243302, %v485_v36  ;;  %305 = vmatpush.msra.mxu2 %v131_v38 }
 0x1c8   :  { %v208_v49 = vadd.f32 1.1283791, %v207_v43 }
 0x1c9   :  { %756 = vrcp.f32 %v219_v33  ;;  %v498_v37 = vmul.f32 %v497_v35, %v480_v15  ;;  %v487_v46 = vmul.f32 %v486_v40, %v480_v15  ;;  %v231_v48 = vand.u32 2147483648, %v219_v33  ;;  %v129_v40 = vld [vmem:[#allocation8 + $0x8] sm:$0xff] }
 0x1ca   :  { %v229_v51 = vand.u32 2147483647, %v219_v33  ;;  %vm225_vm9 = vweird.f32 %v219_v33  ;;  %v209_v56 = vmul.f32 %v208_v49, %v196_v59 }
 0x1cb   :  { %v499_v39 = vadd.f32 0.4994258, %v498_v37  ;;  %v488_v52 = vadd.f32 0.18741608, %v487_v46  ;;  %v232_v54 = vor.u32 1.1754944e-38, %v231_v48 }
 0x1cc   :  { %vm230_vm11 = vcmp.eq.f32.partialorder %v229_v51, 8.507059e+37 }
 0x1cd   :  { %v500_v41 = vmul.f32 %v499_v39, %v480_v15  ;;  %v489_v61 = vmul.f32 %v488_v52, %v480_v15  ;;  %v130_v39 = vld [vmem:[#allocation8 + $0x10] sm:$0xff] }
 0x1ce   :  { %306 = vmatpush.msra.mxu2 %v130_v39 }
 0x1cf   :  { %v757_v42 = vpop.eup %756  ;;  %v501_v45 = vadd.f32 1.0, %v500_v41  ;;  %v490_v7 = vadd.f32 1.1283791, %v489_v61  ;;  %v128_v41 = vld [vmem:[#allocation8] sm:$0xff] }
 0x1d0   :  { %v221_v44 = vmul.f32 %v757_v42, %v219_v33  ;;  %vm226_vm8 = vweird.f32 %v757_v42  ;;  %307 = vmatpush.msra.mxu2 %v129_v40 }
 0x1d1   :  { %758 = vrcp.f32 %v501_v45  ;;  %vm227_vm10 = vmor %vm225_vm9, %vm226_vm8  ;;  %v513_v2 = vand.u32 2147483648, %v501_v45  ;;  %v511_v10 = vand.u32 2147483647, %v501_v45  ;;  %vm507_vm13 = vweird.f32 %v501_v45 }
 0x1d2   :  { %v222_v47 = vsub.f32 1.0, %v221_v44  ;;  %v491_v16 = vmul.f32 %v490_v7, %v1068_v9  ;;  %308 = vmatpush.msra.mxu2 %v128_v41 }
 0x1d3   :  { %v514_v59 = vor.u32 1.1754944e-38, %v513_v2  ;;  %vm512_vm15 = vcmp.eq.f32.partialorder %v511_v10, 8.507059e+37 }
 0x1d4   :  { %v223_v50 = vmul.f32 %v757_v42, %v222_v47  ;;  %583 = vmatpush.msrb.mxu2 %v131_v38 }
 0x1d6   :  { %v224_v53 = vadd.f32 %v757_v42, %v223_v50  ;;  %584 = vmatpush.msrb.mxu2 %v130_v39 }
 0x1d7   :  { %v759_v55 = vpop.eup %758 }
 0x1d8   :  { %v228_v58 = vsel %vm227_vm10, %v757_v42, %v224_v53  ;;  %v503_v62 = vmul.f32 %v759_v55, %v501_v45  ;;  %vm508_vm12 = vweird.f32 %v759_v55  ;;  %585 = vmatpush.msrb.mxu2 %v129_v40 }
 0x1d9   :  { %v233_v60 = vsel %vm230_vm11, %v232_v54, %v228_v58  ;;  %vm509_vm14 = vmor %vm507_vm13, %vm508_vm12 }
 0x1da   :  { %v234_v63 = vmul.f32 %v233_v60, %v209_v56  ;;  %v504_v0 = vsub.f32 1.0, %v503_v62  ;;  %586 = vmatpush.msrb.mxu2 %v128_v41  ;;  %v285_v56 = vperm.slane %v1047_v6, 4  ;;  %v287_v62 = vperm.slane %v1047_v6, 5 }
 0x1dc   :  { %v727_v1 = vclamps-f32 %v234_v63, 1.0  ;;  %v505_v8 = vmul.f32 %v759_v55, %v504_v0 }
 0x1de   :  { %v237_v12 = vadd.f32 1.0, %v727_v1  ;;  %v506_v13 = vadd.f32 %v759_v55, %v505_v8 }
 0x1e0   :  { %v238_v14 = vmul.f32 %v237_v12, %v195_v11  ;;  %v510_v15 = vsel %vm509_vm14, %v759_v55, %v506_v13  ;;  %v289_v13 = vperm.slane %v1047_v6, 6 }
 0x1e1   :  { %v515_v17 = vsel %vm512_vm15, %v514_v59, %v510_v15 }
 0x1e2   :  { %728 = vmatmul.msk.f32.vlgmr.msra.gmra.mxu1 %vm138_vm0, %v238_v14  ;;  %v516_v18 = vmul.f32 %v515_v17, %v491_v16 }
 0x1e4   :  { %v734_v19 = vclamps-f32 %v516_v18, 1.0 }
 0x1e6   :  { %v519_v22 = vadd.f32 1.0, %v734_v19 }
 0x1e8   :  { %v520_v23 = vmul.f32 %v519_v22, %v477_v21 }
 0x1ea   :  { %735 = vmatmul.msk.f32.vlgmr.msrb.gmra.mxu1 %vm138_vm0, %v520_v23 }
 0x25f   :  { %v260_v24 = vpop.f32.mrf.mxu1 }
 0x260   :  { %v261_v25 = vadd.f32 %v260_v24, %v239_v57 }
 0x262   :  { %v263_v26 = vsel %vm138_vm0, %v261_v25, 0.0 }
 0x263   :  { %264 = vadd.xlane.f32.xlu2 %v263_v26 }
 0x267   :  { %v541_v9 = vpop.f32.mrf.mxu1 }
 0x268   :  { %v542_v27 = vadd.f32 %v541_v9, %v239_v57 }
 0x26a   :  { %v544_v28 = vsel %vm138_vm0, %v542_v27, 0.0 }
 0x26b   :  { %545 = vadd.xlane.f32.xlu2 %v544_v28 }
 0x2d6   :  { %v265_v29 = vpop.xlane.xlu2 %264 }
 0x2d7   :  { %v266_v30 = vmul.f32 %v265_v29, %v1052_v20 }
 0x2d9   :  { %v267_v3 = vsub.f32 %v261_v25, %v266_v30  ;;  %v135_v30 = vld [vmem:[#allocation10 + $0x18] sm:$0xff] }
 0x2da   :  { %399 = vmatpush.msra.mxu3 %v135_v30 }
 0x2db   :  { %v268_v31 = vmul.f32 %v267_v3, %v267_v3 }
 0x2dd   :  { %v269_v32 = vsel %vm138_vm0, %v268_v31, 0.0 }
 0x2de   :  { %270 = vadd.xlane.f32.xlu0 %v269_v32  ;;  %v546_v33 = vpop.xlane.xlu2 %545  ;;  %v133_v32 = vld [vmem:[#allocation10 + $0x8] sm:$0xff] }
 0x2df   :  { %v547_v34 = vmul.f32 %v546_v33, %v1052_v20  ;;  %v132_v33 = vld [vmem:[#allocation10] sm:$0xff] }
 0x2e1   :  { %v548_v35 = vsub.f32 %v542_v27, %v547_v34 }
 0x2e3   :  { %v549_v36 = vmul.f32 %v548_v35, %v548_v35 }
 0x2e5   :  { %v550_v37 = vsel %vm138_vm0, %v549_v36, 0.0 }
 0x2e6   :  { %551 = vadd.xlane.f32.xlu1 %v550_v37 }
 0x351   :  { %v271_v42 = vpop.xlane.xlu0 %270 }
 0x352   :  { %v272_v43 = vmul.f32 %v271_v42, %v1052_v20 }
 0x354   :  { %v273_v44 = vadd.f32 1e-05, %v272_v43 }
 0x356   :  { %760 = vrsqrt.f32 %v273_v44  ;;  %vm280_vm2 = vweird.f32 %v273_v44 }
 0x359   :  { %v552_v45 = vpop.xlane.xlu1 %551 }
 0x35a   :  { %v553_v46 = vmul.f32 %v552_v45, %v1052_v20 }
 0x35c   :  { %v761_v47 = vpop.eup %760  ;;  %v554_v49 = vadd.f32 1e-05, %v553_v46 }
 0x35d   :  { %v275_v48 = vmul.f32 %v761_v47, %v273_v44  ;;  %vm281_vm1 = vweird.f32 %v761_v47  ;;  %v1105_v44 = vld [vmem:[#allocation11 + $0x8] sm:$0xff] }
 0x35e   :  { %762 = vrsqrt.f32 %v554_v49  ;;  %vm282_vm3 = vmor %vm280_vm2, %vm281_vm1  ;;  %vm561_vm5 = vweird.f32 %v554_v49 }
 0x35f   :  { %v276_v50 = vmul.f32 %v761_v47, %v275_v48 }
 0x361   :  { %v277_v51 = vmul.f32 0.5, %v276_v50 }
 0x363   :  { %v278_v52 = vsub.f32 1.5, %v277_v51 }
 0x364   :  { %v763_v53 = vpop.eup %762 }
 0x365   :  { %v279_v54 = vmul.f32 %v761_v47, %v278_v52  ;;  %v556_v55 = vmul.f32 %v763_v53, %v554_v49  ;;  %vm562_vm4 = vweird.f32 %v763_v53  ;;  %v337_v49 = vperm.slane %v1105_v44, 0 }
 0x366   :  { %vm563_vm6 = vmor %vm561_vm5, %vm562_vm4 }
 0x367   :  { %v283_v58 = vsel %vm282_vm3, %v761_v47, %v279_v54  ;;  %v557_v60 = vmul.f32 %v763_v53, %v556_v55 }
 0x368   :  { %v284_v61 = vmul.f32 %v283_v58, %v267_v3  ;;  %v134_v3 = vld [vmem:[#allocation10 + $0x10] sm:$0xff] }
 0x369   :  { %v558_v63 = vmul.f32 0.5, %v557_v60  ;;  %400 = vmatpush.msra.mxu3 %v134_v3 }
 0x36a   :  { %v286_v0 = vmul.f32 %v285_v56, %v284_v61 }
 0x36b   :  { %v559_v1 = vsub.f32 1.5, %v558_v63  ;;  %401 = vmatpush.msra.mxu3 %v133_v32 }
 0x36c   :  { %v1088_v2 = vadd.f32 %v287_v62, %v286_v0 }
 0x36d   :  { %v560_v7 = vmul.f32 %v763_v53, %v559_v1  ;;  %402 = vmatpush.msra.mxu3 %v132_v33 }
 0x36e   :  { %729 = vmatmul.msk.f32.vlgmr.msra.gmra.mxu2 %vm138_vm0, %v1088_v2 }
 0x36f   :  { %v564_v8 = vsel %vm563_vm6, %v763_v53, %v560_v7  ;;  %674 = vmatpush.msrb.mxu3 %v135_v30 }
 0x370   :  { %v565_v10 = vmul.f32 %v564_v8, %v548_v35 }
 0x371   :  { %675 = vmatpush.msrb.mxu3 %v134_v3 }
 0x372   :  { %v566_v11 = vmul.f32 %v565_v10, %v285_v56 }
 0x373   :  { %676 = vmatpush.msrb.mxu3 %v133_v32 }
 0x374   :  { %v1092_v12 = vadd.f32 %v566_v11, %v287_v62 }
 0x375   :  { %677 = vmatpush.msrb.mxu3 %v132_v33 }
 0x376   :  { %736 = vmatmul.msk.f32.vlgmr.msrb.gmra.mxu2 %vm138_vm0, %v1092_v12 }
 0x3f1   :  { %v310_v14 = vpop.f32.mrf.mxu2 }
 0x3f2   :  { %v311_v59 = vadd.f32 %v310_v14, %v289_v13 }
 0x3f4   :  { %v313_v16 = vsel %vm138_vm0, %v311_v59, 0.0 }
 0x3f5   :  { %314 = vadd.xlane.f32.xlu2 %v313_v16 }
 0x3f9   :  { %v588_v15 = vpop.f32.mrf.mxu2 }
 0x3fa   :  { %v589_v17 = vadd.f32 %v588_v15, %v289_v13 }
 0x3fc   :  { %v591_v18 = vsel %vm138_vm0, %v589_v17, 0.0 }
 0x3fd   :  { %592 = vadd.xlane.f32.xlu0 %v591_v18 }
 0x468   :  { %v315_v19 = vpop.xlane.xlu2 %314 }
 0x469   :  { %v316_v21 = vmul.f32 %v315_v19, %v1052_v20 }
 0x46b   :  { %v317_v22 = vsub.f32 %v311_v59, %v316_v21 }
 0x46d   :  { %v318_v23 = vmul.f32 %v317_v22, %v317_v22 }
 0x46f   :  { %v319_v57 = vsel %vm138_vm0, %v318_v23, 0.0 }
 0x470   :  { %320 = vadd.xlane.f32.xlu1 %v319_v57  ;;  %v593_v24 = vpop.xlane.xlu0 %592 }
 0x471   :  { %v594_v25 = vmul.f32 %v593_v24, %v1052_v20 }
 0x473   :  { %v595_v26 = vsub.f32 %v589_v17, %v594_v25 }
 0x475   :  { %v596_v9 = vmul.f32 %v595_v26, %v595_v26 }
 0x477   :  { %v597_v27 = vsel %vm138_vm0, %v596_v9, 0.0 }
 0x478   :  { %598 = vadd.xlane.f32.xlu2 %v597_v27 }
 0x4e3   :  { %v321_v28 = vpop.xlane.xlu1 %320 }
 0x4e4   :  { %v322_v29 = vmul.f32 %v321_v28, %v1052_v20 }
 0x4e6   :  { %v323_v31 = vadd.f32 1e-05, %v322_v29 }
 0x4e8   :  { %764 = vrsqrt.f32 %v323_v31  ;;  %vm330_vm8 = vweird.f32 %v323_v31 }
 0x4eb   :  { %v599_v34 = vpop.xlane.xlu2 %598 }
 0x4ec   :  { %v600_v35 = vmul.f32 %v599_v34, %v1052_v20  ;;  %v335_v20 = vperm.slane %v1047_v6, 7 }
 0x4ee   :  { %v765_v36 = vpop.eup %764  ;;  %v601_v38 = vadd.f32 1e-05, %v600_v35 }
 0x4ef   :  { %v325_v37 = vmul.f32 %v765_v36, %v323_v31  ;;  %vm331_vm7 = vweird.f32 %v765_v36 }
 0x4f0   :  { %766 = vrsqrt.f32 %v601_v38  ;;  %vm332_vm9 = vmor %vm330_vm8, %vm331_vm7  ;;  %vm608_vm11 = vweird.f32 %v601_v38 }
 0x4f1   :  { %v326_v39 = vmul.f32 %v765_v36, %v325_v37 }
 0x4f3   :  { %v327_v40 = vmul.f32 0.5, %v326_v39 }
 0x4f5   :  { %v328_v41 = vsub.f32 1.5, %v327_v40 }
 0x4f6   :  { %v767_v42 = vpop.eup %766 }
 0x4f7   :  { %v329_v43 = vmul.f32 %v765_v36, %v328_v41  ;;  %v603_v45 = vmul.f32 %v767_v42, %v601_v38  ;;  %vm609_vm10 = vweird.f32 %v767_v42 }
 0x4f8   :  { %vm610_vm12 = vmor %vm608_vm11, %vm609_vm10 }
 0x4f9   :  { %v333_v46 = vsel %vm332_vm9, %v765_v36, %v329_v43  ;;  %v604_v48 = vmul.f32 %v767_v42, %v603_v45 }
 0x4fa   :  { %v334_v47 = vmul.f32 %v333_v46, %v317_v22 }
 0x4fb   :  { %v605_v50 = vmul.f32 0.5, %v604_v48 }
 0x4fc   :  { %v336_v51 = vmul.f32 %v335_v20, %v334_v47 }
 0x4fd   :  { %v606_v52 = vsub.f32 1.5, %v605_v50 }
 0x4fe   :  { %v1109_v53 = vadd.f32 %v337_v49, %v336_v51 }
 0x4ff   :  { %v607_v54 = vmul.f32 %v767_v42, %v606_v52 }
 0x500   :  { %v1112_v55 = vmul.f32 0.70710677, %v1109_v53 }
 0x501   :  { %v611_v56 = vsel %vm610_vm12, %v767_v42, %v607_v54 }
 0x502   :  { %v341_v6 = vmul.f32 %v1112_v55, %v1112_v55  ;;  %v612_v58 = vmul.f32 %v611_v56, %v595_v26 }
 0x504   :  { %v342_v60 = vmin.f32 %v341_v6, 16.0  ;;  %v613_v61 = vmul.f32 %v612_v58, %v335_v20 }
 0x506   :  { %v343_v62 = vmul.f32 2.1237322e-06, %v342_v60  ;;  %v354_v63 = vmul.f32 3.8918573e-05, %v342_v60  ;;  %v1116_v0 = vadd.f32 %v613_v61, %v337_v49 }
 0x508   :  { %v344_v1 = vadd.f32 0.00028619796, %v343_v62  ;;  %v355_v7 = vadd.f32 0.001143296, %v354_v63  ;;  %v1119_v8 = vmul.f32 0.70710677, %v1116_v0 }
 0x50a   :  { %v345_v10 = vmul.f32 %v344_v1, %v342_v60  ;;  %v356_v11 = vmul.f32 %v355_v7, %v342_v60  ;;  %v617_v13 = vmul.f32 %v1119_v8, %v1119_v8 }
 0x50c   :  { %v357_v14 = vadd.f32 0.014752088, %v356_v11  ;;  %v346_v59 = vadd.f32 0.0036580483, %v345_v10  ;;  %v618_v16 = vmin.f32 %v617_v13, 16.0  ;;  %v339_v13 = vmul.f32 0.5, %v1109_v53 }
 0x50d   :  { %v383_v53 = vperm.slane %v1105_v44, 1 }
 0x50e   :  { %v358_v15 = vmul.f32 %v357_v14, %v342_v60  ;;  %v619_v17 = vmul.f32 2.1237322e-06, %v618_v16  ;;  %v630_v18 = vmul.f32 3.8918573e-05, %v618_v16  ;;  %v347_v21 = vmul.f32 %v346_v59, %v342_v60 }
 0x510   :  { %v359_v19 = vadd.f32 0.112945676, %v358_v15  ;;  %v620_v22 = vadd.f32 0.00028619796, %v619_v17  ;;  %v631_v23 = vadd.f32 0.001143296, %v630_v18 }
 0x511   :  { %v348_v9 = vadd.f32 0.05243302, %v347_v21 }
 0x512   :  { %v360_v57 = vmul.f32 %v359_v19, %v342_v60  ;;  %v621_v24 = vmul.f32 %v620_v22, %v618_v16  ;;  %v632_v25 = vmul.f32 %v631_v23, %v618_v16  ;;  %v615_v22 = vmul.f32 0.5, %v1116_v0 }
 0x513   :  { %v349_v31 = vmul.f32 %v348_v9, %v342_v60 }
 0x514   :  { %v361_v26 = vadd.f32 0.4994258, %v360_v57  ;;  %v633_v27 = vadd.f32 0.014752088, %v632_v25  ;;  %v622_v29 = vadd.f32 0.0036580483, %v621_v24 }
 0x515   :  { %v350_v35 = vadd.f32 0.18741608, %v349_v31 }
 0x516   :  { %v362_v28 = vmul.f32 %v361_v26, %v342_v60  ;;  %v634_v30 = vmul.f32 %v633_v27, %v618_v16  ;;  %v623_v33 = vmul.f32 %v622_v29, %v618_v16 }
 0x517   :  { %v351_v40 = vmul.f32 %v350_v35, %v342_v60 }
 0x518   :  { %v363_v3 = vadd.f32 1.0, %v362_v28  ;;  %v635_v32 = vadd.f32 0.112945676, %v634_v30  ;;  %v624_v37 = vadd.f32 0.05243302, %v623_v33 }
 0x519   :  { %v352_v46 = vadd.f32 1.1283791, %v351_v40 }
 0x51a   :  { %768 = vrcp.f32 %v363_v3  ;;  %v636_v34 = vmul.f32 %v635_v32, %v618_v16  ;;  %v625_v43 = vmul.f32 %v624_v37, %v618_v16  ;;  %v375_v45 = vand.u32 2147483648, %v363_v3 }
 0x51b   :  { %v373_v48 = vand.u32 2147483647, %v363_v3  ;;  %vm369_vm14 = vweird.f32 %v363_v3  ;;  %v353_v54 = vmul.f32 %v352_v46, %v1112_v55 }
 0x51c   :  { %v637_v36 = vadd.f32 0.4994258, %v636_v34  ;;  %v626_v49 = vadd.f32 0.18741608, %v625_v43  ;;  %v376_v51 = vor.u32 1.1754944e-38, %v375_v45 }
 0x51d   :  { %vm374_vm1 = vcmp.eq.f32.partialorder %v373_v48, 8.507059e+37 }
 0x51e   :  { %v638_v38 = vmul.f32 %v637_v36, %v618_v16  ;;  %v627_v58 = vmul.f32 %v626_v49, %v618_v16 }
 0x520   :  { %v769_v39 = vpop.eup %768  ;;  %v639_v42 = vadd.f32 1.0, %v638_v38  ;;  %v628_v7 = vadd.f32 1.1283791, %v627_v58 }
 0x521   :  { %v365_v41 = vmul.f32 %v769_v39, %v363_v3  ;;  %vm370_vm13 = vweird.f32 %v769_v39 }
 0x522   :  { %770 = vrcp.f32 %v639_v42  ;;  %vm371_vm15 = vmor %vm369_vm14, %vm370_vm13  ;;  %v651_v1 = vand.u32 2147483648, %v639_v42  ;;  %v649_v11 = vand.u32 2147483647, %v639_v42  ;;  %vm645_vm3 = vweird.f32 %v639_v42 }
 0x523   :  { %v366_v20 = vsub.f32 1.0, %v365_v41  ;;  %v629_v17 = vmul.f32 %v628_v7, %v1119_v8 }
 0x524   :  { %v652_v55 = vor.u32 1.1754944e-38, %v651_v1  ;;  %vm650_vm5 = vcmp.eq.f32.partialorder %v649_v11, 8.507059e+37 }
 0x525   :  { %v367_v47 = vmul.f32 %v769_v39, %v366_v20 }
 0x527   :  { %v368_v50 = vadd.f32 %v769_v39, %v367_v47 }
 0x528   :  { %v771_v52 = vpop.eup %770 }
 0x529   :  { %v372_v56 = vsel %vm371_vm15, %v769_v39, %v368_v50  ;;  %v641_v60 = vmul.f32 %v771_v52, %v639_v42  ;;  %vm646_vm2 = vweird.f32 %v771_v52 }
 0x52a   :  { %v377_v6 = vsel %vm374_vm1, %v376_v51, %v372_v56  ;;  %vm647_vm4 = vmor %vm645_vm3, %vm646_vm2 }
 0x52b   :  { %v378_v61 = vmul.f32 %v377_v6, %v353_v54  ;;  %v642_v62 = vsub.f32 1.0, %v641_v60 }
 0x52d   :  { %v730_v63 = vclamps-f32 %v378_v61, 1.0  ;;  %v643_v10 = vmul.f32 %v771_v52, %v642_v62 }
 0x52f   :  { %v381_v14 = vadd.f32 1.0, %v730_v63  ;;  %v644_v59 = vadd.f32 %v771_v52, %v643_v10 }
 0x531   :  { %v382_v15 = vmul.f32 %v381_v14, %v339_v13  ;;  %v648_v16 = vsel %vm647_vm4, %v771_v52, %v644_v59 }
 0x532   :  { %v653_v18 = vsel %vm650_vm5, %v652_v55, %v648_v16 }
 0x533   :  { %731 = vmatmul.msk.f32.vlgmr.msra.gmra.mxu3 %vm138_vm0, %v382_v15  ;;  %v654_v19 = vmul.f32 %v653_v18, %v629_v17 }
 0x535   :  { %v737_v21 = vclamps-f32 %v654_v19, 1.0 }
 0x537   :  { %v657_v23 = vadd.f32 1.0, %v737_v21 }
 0x539   :  { %v658_v57 = vmul.f32 %v657_v23, %v615_v22 }
 0x53b   :  { %738 = vmatmul.msk.f32.vlgmr.msrb.gmra.mxu3 %vm138_vm0, %v658_v57 }
 0x5b6   :  { %v404_v24 = vpop.f32.mrf.mxu3 }
 0x5b7   :  { %v405_v25 = vadd.f32 %v404_v24, %v383_v53 }
 0x5b9   :  { %v732_v26 = vmul.f32 -1.442695, %v405_v25 }
 0x5bb   :  { %772 = vpow2.f32 %v732_v26 }
 0x5be   :  { %v679_v8 = vpop.f32.mrf.mxu3 }
 0x5bf   :  { %v680_v9 = vadd.f32 %v679_v8, %v383_v53 }
 0x5c1   :  { %v773_v27 = vpop.eup %772  ;;  %v739_v29 = vmul.f32 -1.442695, %v680_v9 }
 0x5c2   :  { %v410_v28 = vadd.f32 1.0, %v773_v27 }
 0x5c4   :  { %774 = vrcp.f32 %v410_v28  ;;  %v422_v33 = vand.u32 2147483648, %v410_v28  ;;  %v420_v44 = vand.u32 2147483647, %v410_v28  ;;  %vm416_vm7 = vweird.f32 %v410_v28 }
 0x5c5   :  { %776 = vpow2.f32 %v739_v29 }
 0x5c6   :  { %v423_v36 = vor.u32 1.1754944e-38, %v422_v33  ;;  %vm421_vm9 = vcmp.eq.f32.partialorder %v420_v44, 8.507059e+37 }
 0x5ca   :  { %v775_v30 = vpop.eup %774 }
 0x5cb   :  { %v777_v3 = vpop.eup %776  ;;  %v412_v0 = vmul.f32 %v775_v30, %v410_v28  ;;  %vm417_vm6 = vweird.f32 %v775_v30 }
 0x5cc   :  { %v685_v31 = vadd.f32 1.0, %v777_v3  ;;  %vm418_vm8 = vmor %vm416_vm7, %vm417_vm6 }
 0x5cd   :  { %v413_v32 = vsub.f32 1.0, %v412_v0 }
 0x5ce   :  { %778 = vrcp.f32 %v685_v31  ;;  %v697_v20 = vand.u32 2147483648, %v685_v31  ;;  %v695_v46 = vand.u32 2147483647, %v685_v31  ;;  %vm691_vm11 = vweird.f32 %v685_v31 }
 0x5cf   :  { %v414_v34 = vmul.f32 %v775_v30, %v413_v32 }
 0x5d0   :  { %v698_v48 = vor.u32 1.1754944e-38, %v697_v20  ;;  %vm696_vm13 = vcmp.eq.f32.partialorder %v695_v46, 8.507059e+37 }
 0x5d1   :  { %v415_v35 = vadd.f32 %v775_v30, %v414_v34 }
 0x5d3   :  { %v419_v37 = vsel %vm418_vm8, %v775_v30, %v415_v35 }
 0x5d4   :  { %v779_v38 = vpop.eup %778  ;;  %v424_v39 = vsel %vm421_vm9, %v423_v36, %v419_v37 }
 0x5d5   :  { %v687_v40 = vmul.f32 %v779_v38, %v685_v31  ;;  %v426_v41 = vmul.f32 %v424_v39, %v1088_v2  ;;  %vm692_vm10 = vweird.f32 %v779_v38 }
 0x5d6   :  { %vm693_vm12 = vmor %vm691_vm11, %vm692_vm10 }
 0x5d7   :  { %v688_v42 = vsub.f32 1.0, %v687_v40  ;;  %v427_v43 = vadd.f32 %v426_v41, %v1039_v4 }
 0x5d9   :  { %v689_v45 = vmul.f32 %v779_v38, %v688_v42  ;;  %428 = vst.msk [vmem:[#allocation13] sm:$0xff] %vm138_vm0, %v427_v43 }
 0x5db   :  { %v690_v47 = vadd.f32 %v779_v38, %v689_v45 }
 0x5dd   :  { %v694_v49 = vsel %vm693_vm12, %v779_v38, %v690_v47 }
 0x5de   :  { %v699_v50 = vsel %vm696_vm13, %v698_v48, %v694_v49 }
 0x5df   :  { %v701_v4 = vmul.f32 %v699_v50, %v1092_v12 }
 0x5e1   :  { %v702_v2 = vadd.f32 %v701_v4, %v1043_v5 }
 0x5e3   :  { %703 = vst.msk [vmem:[#allocation13 + $0x8] sm:$0xff] %vm138_vm0, %v702_v2 }
 0x5e4   :  { %716 = dma.vmem_to_hbm [thread:$0]  %s709_s24, 256, %s711_s27, [#allocation4], %s959_s29, %s959_s29, %s960_s30  }
 0x5e5   :  { %956 = dma.done.wait [#allocation4], 256  }
 0x5e6   :  { %957 = vsyncadd [#allocation4], 4294967040 }
 0x5e7   :  { %721 = vsyncpa [#allocation3], 1 }
 0x5e8   :  { %722 = vsyncpa [#allocation6], 1 }
 0x5e9   :  { %723 = vsyncpa [#allocation9], 1 }
 0x5ea   :  { %724 = vsyncpa [#allocation12], 1 }
 0x5eb   :  { %725 = vsyncpa [#allocation4], 1 }

</bundles_post_ra>
